<compile_context>
chip_gen: v6e
topology: v6e:2x2x1
jax: 0.10.0
libtpu: 0.0.40
codegen_flags: <defaults>
</compile_context>

<pallas_src>
import functools

import jax
import jax.numpy as jnp
import numpy as np
from jax.experimental import pallas as pl
from jax.experimental.pallas import tpu as pltpu

_LANE = 128
_SUBLANE = 8


def _round_up(v, m):
    return (v + m - 1) // m * m


def _target_rows_per_step():
    """~128 MXU sublane rows per grid step on v5e (4x128x128), ~256 on v6e/v7x (2x256x256)."""
    try:
        kind = jax.devices()[0].device_kind.lower()
    except Exception:
        return 256
    if "v5 lite" in kind or "v5e" in kind or "v5lite" in kind:
        return 128
    return 256


def _transformer_layer_kernel(x_ref,
                              wqkv_ref, bqkv_ref,
                              wo_ref, bo_ref,
                              w1_ref, w2_ref,
                              o_ref,
                              ctx_ref,
                              *, H, d, dp, L, cdt, packed):
    f32 = jnp.float32
    nb, Lp, Ep = x_ref.shape
    R = nb * Lp
    HD = wo_ref.shape[0]            # Ep (packed heads) or H*dp (per-head lane blocks)

    xr = x_ref[...].reshape(R, Ep)  # (R, Ep) bf16 activations
    xf = xr.astype(f32)             # f32 copy for residuals

    # One fused Q/K/V projection (user Linear + MHA in-proj + 1/sqrt(d) folded on host).
    qkv = jnp.dot(xr, wqkv_ref[...], preferred_element_type=f32) + bqkv_ref[...]
    q = qkv[:, :HD]                 # lane-aligned slices (HD % 128 == 0)
    k = qkv[:, HD:2 * HD]
    v = qkv[:, 2 * HD:]

    q_c = q.astype(cdt).reshape(nb, Lp, HD)
    k_c = k.astype(cdt).reshape(nb, Lp, HD)
    v_c = v.astype(cdt).reshape(nb, Lp, HD)

    need_key_mask = Lp > L
    if need_key_mask:
        key_ids = jax.lax.broadcasted_iota(jnp.int32, (1, 1, Lp), 2)

    if packed:
        lane_ids = jax.lax.broadcasted_iota(jnp.int32, (1, 1, HD), 2)
        zero = jnp.zeros((), cdt)
        ctx_ref[...] = jnp.zeros_like(ctx_ref)   # heads accumulate into shared columns

    # TODO(synk): for H >~ 8 switch to lax.fori_loop(..., unroll=True) to bound vreg live ranges.
    for h in range(H):
        if packed:
            # Head h lives at columns [h*d, (h+1)*d) of the single lane block.
            # Masking q (and v) on the VPU makes the 128-lane contraction exactly
            # this head's score/context; k needs no mask (q's zeros kill cross terms).
            hm = (lane_ids >= h * d) & (lane_ids < (h + 1) * d)
            qh = jnp.where(hm, q_c, zero)
            kh = k_c
            vh = jnp.where(hm, v_c, zero)
        else:
            sl = slice(h * dp, (h + 1) * dp)     # lane-aligned per-head block
            qh = q_c[:, :, sl]
            kh = k_c[:, :, sl]
            vh = v_c[:, :, sl]

        s = jnp.einsum('nld,nmd->nlm', qh, kh, preferred_element_type=f32)
        if need_key_mask:
            s = jnp.where(key_ids < L, s, -1e30)
        s = s - jnp.max(s, axis=-1, keepdims=True)
        p = jnp.exp(s)                                                     # f32 softmax
        p = p * pl.reciprocal(jnp.sum(p, axis=-1, keepdims=True), approx=True)

        ah = jnp.einsum('nlm,nmd->nld', p.astype(cdt), vh,
                        preferred_element_type=f32).reshape(R, -1)
        if packed:
            ctx_ref[...] = ctx_ref[...] + ah     # disjoint head columns -> exact sum
        else:
            ctx_ref[:, sl] = ah                  # free lane-aligned block store

    # Single out-projection matmul over the full head dimension, then residual.
    mha = jnp.dot(ctx_ref[...].astype(cdt), wo_ref[...], preferred_element_type=f32)
    y = mha + bo_ref[...] + xf

    # feed-forward: fc2(fc1(y)) + y   (both bias-free)
    h1 = jnp.dot(y.astype(cdt), w1_ref[...], preferred_element_type=f32)
    z = jnp.dot(h1.astype(cdt), w2_ref[...], preferred_element_type=f32) + y

    o_ref[...] = z.reshape(nb, Lp, Ep).astype(o_ref.dtype)


def prepare_transformer_params(params, num_heads, compute_dtype=jnp.bfloat16):
    """One-time host-side weight fusion / padding.  Cache the result across calls."""
    E = params["wq"].shape[0]
    H = num_heads
    d = E // H
    f32 = jnp.float32

    Ep = _round_up(E, _LANE)
    packed = Ep <= _LANE            # all heads fit one lane block -> no per-head lane padding
    dp = d if packed else _round_up(d, _LANE)
    HD = Ep if packed else H * dp

    Wi = params["in_proj_w"].astype(f32)          # (3E, E)
    bi = params["in_proj_b"].astype(f32)          # (3E,)
    scale = 1.0 / float(np.sqrt(d))

    # Fuse the user q/k/v Linear with the MHA in-projection; fold 1/sqrt(d) into q.
    wq_eff = (params["wq"].T.astype(f32) @ Wi[:E].T) * scale      # (E, E)
    bq_eff = bi[:E] * scale
    wk_eff = params["wk"].T.astype(f32) @ Wi[E:2 * E].T
    bk_eff = bi[E:2 * E]
    wv_eff = params["wv"].T.astype(f32) @ Wi[2 * E:].T
    bv_eff = bi[2 * E:]

    if packed:
        def pad_proj(w, b):
            wp = jnp.zeros((Ep, HD), f32).at[:E, :E].set(w)
            bp = jnp.zeros((1, HD), f32).at[0, :E].set(b)
            return wp, bp
        wo_p = jnp.zeros((HD, Ep), f32).at[:E, :E].set(params["out_proj_w"].T.astype(f32))
    else:
        def pad_proj(w, b):
            w3 = w.reshape(E, H, d)
            wp = jnp.zeros((Ep, H, dp), f32).at[:E, :, :d].set(w3).reshape(Ep, HD)
            bp = jnp.zeros((H, dp), f32).at[:, :d].set(b.reshape(H, d)).reshape(1, HD)
            return wp, bp
        wo3 = params["out_proj_w"].T.astype(f32).reshape(H, d, E)
        wo_p = jnp.zeros((H, dp, Ep), f32).at[:, :d, :E].set(wo3).reshape(HD, Ep)

    wq_p, bq_p = pad_proj(wq_eff, bq_eff)
    wk_p, bk_p = pad_proj(wk_eff, bk_eff)
    wv_p, bv_p = pad_proj(wv_eff, bv_eff)

    # Single concatenated QKV weight/bias -> one projection matmul in the kernel.
    wqkv = jnp.concatenate([wq_p, wk_p, wv_p], axis=1).astype(compute_dtype)   # (Ep, 3*HD)
    bqkv = jnp.concatenate([bq_p, bk_p, bv_p], axis=1)                          # (1, 3*HD) f32

    bo_p = jnp.zeros((1, Ep), f32).at[0, :E].set(params["out_proj_b"].astype(f32))
    w1_p = jnp.zeros((Ep, Ep), f32).at[:E, :E].set(params["w1"].T.astype(f32)).astype(compute_dtype)
    w2_p = jnp.zeros((Ep, Ep), f32).at[:E, :E].set(params["w2"].T.astype(f32)).astype(compute_dtype)

    weights = (wqkv, bqkv, wo_p.astype(compute_dtype), bo_p, w1_p, w2_p)
    meta = dict(E=E, H=H, d=d, dp=dp, Ep=Ep, HD=HD, packed=packed,
                compute_dtype=compute_dtype)
    return weights, meta


def transformer_layer_pallas(x, weights, meta):
    """x: (L, N, E) float32, PyTorch seq-first layout."""
    L, N, E = x.shape
    assert E == meta["E"]
    H, d, dp, Ep, HD = meta["H"], meta["d"], meta["dp"], meta["Ep"], meta["HD"]
    packed = meta["packed"]
    cdt = meta["compute_dtype"]

    Lp = _round_up(L, _SUBLANE)

    # Samples per grid step: target ~128 (v5e) / ~256 (v6e, v7x) rows, clamped to the
    # real batch (no fake samples), balanced across steps to minimize padding.
    target_rows = _target_rows_per_step()
    nb0 = max(1, min(max(target_rows // Lp, 1), N))
    steps = -(-N // nb0)
    nb = -(-N // steps)
    Np = nb * steps

    wqkv, bqkv, wo_p, bo_p, w1_p, w2_p = weights

    # activations: (L, N, E) -> (N, L, E), cast to bf16, single-pass zero pad.
    x_nle = jnp.transpose(x, (1, 0, 2)).astype(cdt)
    if (Np, Lp, Ep) != (N, L, E):
        x_pad = jnp.pad(x_nle, ((0, Np - N), (0, Lp - L), (0, Ep - E)))
    else:
        x_pad = x_nle

    x_spec = pl.BlockSpec((nb, Lp, Ep), lambda n: (n, 0, 0))

    def const_spec(shape):
        # Constant index map: Pallas skips re-DMA of the weights across grid steps.
        return pl.BlockSpec(shape, lambda n: (0, 0))

    kernel = functools.partial(_transformer_layer_kernel,
                               H=H, d=d, dp=dp, L=L, cdt=cdt, packed=packed)

    out = pl.pallas_call(
        kernel,
        out_shape=jax.ShapeDtypeStruct((Np, Lp, Ep), jnp.float32),
        grid=(steps,),
        in_specs=[x_spec,
                  const_spec((Ep, 3 * HD)), const_spec((1, 3 * HD)),   # fused QKV
                  const_spec((HD, Ep)), const_spec((1, Ep)),           # out-projection
                  const_spec((Ep, Ep)), const_spec((Ep, Ep))],         # fc1, fc2
        out_specs=x_spec,
        scratch_shapes=[pltpu.VMEM((nb * Lp, HD), jnp.float32)],       # per-step head context
        compiler_params=pltpu.CompilerParams(
            dimension_semantics=("parallel",),
            vmem_limit_bytes=32 * 1024 * 1024),
    )(x_pad, wqkv, bqkv, wo_p, bo_p, w1_p, w2_p)

    out = out[:N, :L, :E]
    return jnp.transpose(out, (1, 0, 2)).astype(x.dtype)     # back to (L, N, E)


def transformer_layer_ref(x, p, num_heads):
    """Pure-JAX f32 reference matching PyTorch nn.MultiheadAttention semantics."""
    L, N, E = x.shape
    d = E // num_heads
    xq = x @ p["wq"].T
    xk = x @ p["wk"].T
    xv = x @ p["wv"].T
    Wi, bi = p["in_proj_w"], p["in_proj_b"]
    q = xq @ Wi[:E].T + bi[:E]
    k = xk @ Wi[E:2 * E].T + bi[E:2 * E]
    v = xv @ Wi[2 * E:].T + bi[2 * E:]
    q = q.reshape(L, N * num_heads, d).transpose(1, 0, 2) * (d ** -0.5)
    k = k.reshape(L, N * num_heads, d).transpose(1, 0, 2)
    v = v.reshape(L, N * num_heads, d).transpose(1, 0, 2)
    s = q @ k.transpose(0, 2, 1)
    a = jax.nn.softmax(s, axis=-1)
    o = (a @ v).transpose(1, 0, 2).reshape(L, N, E)
    o = o @ p["out_proj_w"].T + p["out_proj_b"]
    y = o + x
    return (y @ p["w1"].T) @ p["w2"].T + y


def init_params(key, E):
    ks = jax.random.split(key, 9)
    s = 1.0 / np.sqrt(E)
    return {
        "wq": jax.random.uniform(ks[0], (E, E), jnp.float32, -s, s),
        "wk": jax.random.uniform(ks[1], (E, E), jnp.float32, -s, s),
        "wv": jax.random.uniform(ks[2], (E, E), jnp.float32, -s, s),
        "in_proj_w": jax.random.uniform(ks[3], (3 * E, E), jnp.float32, -s, s),
        "in_proj_b": jax.random.uniform(ks[4], (3 * E,), jnp.float32, -s, s),
        "out_proj_w": jax.random.uniform(ks[5], (E, E), jnp.float32, -s, s),
        "out_proj_b": jax.random.uniform(ks[6], (E,), jnp.float32, -s, s),
        "w1": jax.random.uniform(ks[7], (E, E), jnp.float32, -s, s),
        "w2": jax.random.uniform(ks[8], (E, E), jnp.float32, -s, s),
    }


if __name__ == "__main__":
    L, N, E, H = 8, 2, 32, 4   # seq, batch, out_channels, num_heads
    key = jax.random.PRNGKey(0)
    kx, kp = jax.random.split(key)
    x = jax.random.normal(kx, (L, N, E), dtype=jnp.float32)
    params = init_params(kp, E)

    # One-time host-side weight fusion / padding (hoisted out of the per-call jit).
    weights, meta = prepare_transformer_params(params, num_heads=H)
    weights = tuple(jax.block_until_ready(w) for w in weights)

    fwd = jax.jit(functools.partial(transformer_layer_pallas, meta=meta))
    out = jax.block_until_ready(fwd(x, weights))

    ref = transformer_layer_ref(x, params, H)
    # Tolerance reflects bf16 matmul inputs (f32 accumulation) vs. the pure-f32 reference.
    np.testing.assert_allclose(np.asarray(out), np.asarray(ref), rtol=5e-2, atol=5e-2)

    print("KERNEL_OK")
</pallas_src>

<mosaic_0001>
module attributes {stable_mosaic.version = 11 : i64} {
  func.func @_transformer_layer_kernel(%arg0: i32, %arg1: memref<2x8x128xbf16, #tpu.memory_space<vmem>>, %arg2: memref<128x384xbf16, #tpu.memory_space<vmem>>, %arg3: memref<1x384xf32, #tpu.memory_space<vmem>>, %arg4: memref<128x128xbf16, #tpu.memory_space<vmem>>, %arg5: memref<1x128xf32, #tpu.memory_space<vmem>>, %arg6: memref<128x128xbf16, #tpu.memory_space<vmem>>, %arg7: memref<128x128xbf16, #tpu.memory_space<vmem>>, %arg8: memref<2x8x128xf32, #tpu.memory_space<vmem>>, %arg9: memref<16x128xf32, #tpu.memory_space<vmem>>) attributes {dimension_semantics = [#tpu.dimension_semantics<parallel>], iteration_bounds = array<i64: 1>, scalar_prefetch = 0 : i64, scratch_operands = 1 : i64, tpu.core_type = #tpu.core_type<tc>, window_params = [{transform_indices = @transform_0, window_bounds = array<i64: 2, 8, 128>}, {pipeline_mode = #tpu.pipeline_mode<synchronous>, transform_indices = @transform_1, window_bounds = array<i64: 128, 384>}, {pipeline_mode = #tpu.pipeline_mode<synchronous>, transform_indices = @transform_2, window_bounds = array<i64: 1, 384>}, {pipeline_mode = #tpu.pipeline_mode<synchronous>, transform_indices = @transform_3, window_bounds = array<i64: 128, 128>}, {pipeline_mode = #tpu.pipeline_mode<synchronous>, transform_indices = @transform_4, window_bounds = array<i64: 1, 128>}, {pipeline_mode = #tpu.pipeline_mode<synchronous>, transform_indices = @transform_5, window_bounds = array<i64: 128, 128>}, {pipeline_mode = #tpu.pipeline_mode<synchronous>, transform_indices = @transform_6, window_bounds = array<i64: 128, 128>}, {transform_indices = @transform_7, window_bounds = array<i64: 2, 8, 128>}]} {
    %c0 = arith.constant 0 : index
    %c0_0 = arith.constant 0 : index
    %c0_1 = arith.constant 0 : index
    %0 = vector.load %arg1[%c0, %c0_0, %c0_1] : memref<2x8x128xbf16, #tpu.memory_space<vmem>>, vector<2x8x128xbf16>
    %1 = vector.shape_cast %0 : vector<2x8x128xbf16> to vector<16x128xbf16>
    %2 = arith.extf %1 : vector<16x128xbf16> to vector<16x128xf32>
    %c0_2 = arith.constant 0 : index
    %c0_3 = arith.constant 0 : index
    %3 = vector.load %arg2[%c0_2, %c0_3] : memref<128x384xbf16, #tpu.memory_space<vmem>>, vector<128x384xbf16>
    %cst = arith.constant dense<0.000000e+00> : vector<16x384xf32>
    %4 = tpu.matmul %1, %3, %cst {dimension_numbers = #tpu.dot_dimension_numbers<[1], [0], [0], [1], [0, 0, 1, 1], [], []>} : vector<16x128xbf16>, vector<128x384xbf16>, vector<16x384xf32> -> vector<16x384xf32>
    %c0_4 = arith.constant 0 : index
    %c0_5 = arith.constant 0 : index
    %5 = vector.load %arg3[%c0_4, %c0_5] : memref<1x384xf32, #tpu.memory_space<vmem>>, vector<1x384xf32>
    %6 = vector.broadcast %5 : vector<1x384xf32> to vector<16x384xf32>
    %7 = arith.addf %4, %6 : vector<16x384xf32>
    %8 = vector.extract_strided_slice %7 {offsets = [0, 0], sizes = [16, 128], strides = [1, 1]} : vector<16x384xf32> to vector<16x128xf32>
    %9 = vector.extract_strided_slice %7 {offsets = [0, 128], sizes = [16, 128], strides = [1, 1]} : vector<16x384xf32> to vector<16x128xf32>
    %10 = vector.extract_strided_slice %7 {offsets = [0, 256], sizes = [16, 128], strides = [1, 1]} : vector<16x384xf32> to vector<16x128xf32>
    %11 = arith.truncf %8 : vector<16x128xf32> to vector<16x128xbf16>
    %12 = vector.shape_cast %11 : vector<16x128xbf16> to vector<2x8x128xbf16>
    %13 = arith.truncf %9 : vector<16x128xf32> to vector<16x128xbf16>
    %14 = vector.shape_cast %13 : vector<16x128xbf16> to vector<2x8x128xbf16>
    %15 = arith.truncf %10 : vector<16x128xf32> to vector<16x128xbf16>
    %16 = vector.shape_cast %15 : vector<16x128xbf16> to vector<2x8x128xbf16>
    %17 = tpu.iota {dimensions = array<i32: 2>} : vector<1x1x128xi32>
    %cst_6 = arith.constant 0.000000e+00 : f32
    %18 = vector.broadcast %cst_6 : f32 to vector<16x128xf32>
    %c0_7 = arith.constant 0 : index
    %c0_8 = arith.constant 0 : index
    %19 = vector.load %arg9[%c0_7, %c0_8] : memref<16x128xf32, #tpu.memory_space<vmem>>, vector<16x128xf32>
    tpu.vector_store %arg9[%c0_7, %c0_8], %18 {strides = array<i32>} : memref<16x128xf32, #tpu.memory_space<vmem>>, vector<16x128xf32>,
    %c0_i32 = arith.constant 0 : i32
    %20 = vector.broadcast %c0_i32 : i32 to vector<1x1x128xi32>
    %21 = arith.cmpi sge, %17, %20 : vector<1x1x128xi32>
    %c8_i32 = arith.constant 8 : i32
    %22 = vector.broadcast %c8_i32 : i32 to vector<1x1x128xi32>
    %23 = arith.cmpi slt, %17, %22 : vector<1x1x128xi32>
    %24 = arith.andi %21, %23 : vector<1x1x128xi1>
    %cst_9 = arith.constant 0.000000e+00 : bf16
    %25 = vector.shape_cast %24 : vector<1x1x128xi1> to vector<1x1x128xi1>
    %26 = vector.broadcast %25 : vector<1x1x128xi1> to vector<2x8x128xi1>
    %27 = vector.broadcast %cst_9 : bf16 to vector<2x8x128xbf16>
    %28 = arith.select %26, %12, %27 : vector<2x8x128xi1>, vector<2x8x128xbf16>
    %cst_10 = arith.constant 0.000000e+00 : bf16
    %29 = vector.shape_cast %24 : vector<1x1x128xi1> to vector<1x1x128xi1>
    %30 = vector.broadcast %29 : vector<1x1x128xi1> to vector<2x8x128xi1>
    %31 = vector.broadcast %cst_10 : bf16 to vector<2x8x128xbf16>
    %32 = arith.select %30, %16, %31 : vector<2x8x128xi1>, vector<2x8x128xbf16>
    "tpu.trace_start"() <{level = 10 : i32, message = "nld,nmd->nlm"}> : () -> ()
    %cst_11 = arith.constant dense<0.000000e+00> : vector<2x8x8xf32>
    %33 = tpu.matmul %28, %14, %cst_11 {dimension_numbers = #tpu.dot_dimension_numbers<[2], [2], [1], [1], [0, 0, 0, 1, 1, 1], [0], [0]>} : vector<2x8x128xbf16>, vector<2x8x128xbf16>, vector<2x8x8xf32> -> vector<2x8x8xf32>
    "tpu.trace_stop"() : () -> ()
    %cst_12 = arith.constant dense<0xFF800000> : vector<2x8xf32>
    %34 = vector.multi_reduction <maximumf>, %33, %cst_12 [2] : vector<2x8x8xf32> to vector<2x8xf32>
    %35 = vector.shape_cast %34 : vector<2x8xf32> to vector<2x8x1xf32>
    %36 = vector.broadcast %35 : vector<2x8x1xf32> to vector<2x8x8xf32>
    %37 = arith.subf %33, %36 : vector<2x8x8xf32>
    %38 = math.exp %37 : vector<2x8x8xf32>
    %cst_13 = arith.constant dense<0.000000e+00> : vector<2x8xf32>
    %39 = vector.multi_reduction <add>, %38, %cst_13 [2] : vector<2x8x8xf32> to vector<2x8xf32>
    %40 = vector.shape_cast %39 : vector<2x8xf32> to vector<2x8x1xf32>
    %41 = tpu.reciprocal %40 {approx = true} : vector<2x8x1xf32> -> vector<2x8x1xf32>
    %42 = vector.broadcast %41 : vector<2x8x1xf32> to vector<2x8x8xf32>
    %43 = arith.mulf %38, %42 : vector<2x8x8xf32>
    %44 = arith.truncf %43 : vector<2x8x8xf32> to vector<2x8x8xbf16>
    "tpu.trace_start"() <{level = 10 : i32, message = "nlm,nmd->nld"}> : () -> ()
    %cst_14 = arith.constant dense<0.000000e+00> : vector<2x8x128xf32>
    %45 = tpu.matmul %44, %32, %cst_14 {dimension_numbers = #tpu.dot_dimension_numbers<[2], [1], [1], [2], [0, 0, 0, 1, 1, 2], [0], [0]>} : vector<2x8x8xbf16>, vector<2x8x128xbf16>, vector<2x8x128xf32> -> vector<2x8x128xf32>
    "tpu.trace_stop"() : () -> ()
    %46 = vector.shape_cast %45 : vector<2x8x128xf32> to vector<16x128xf32>
    %c0_15 = arith.constant 0 : index
    %c0_16 = arith.constant 0 : index
    %47 = vector.load %arg9[%c0_15, %c0_16] : memref<16x128xf32, #tpu.memory_space<vmem>>, vector<16x128xf32>
    %48 = arith.addf %47, %46 : vector<16x128xf32>
    %c0_17 = arith.constant 0 : index
    %c0_18 = arith.constant 0 : index
    %49 = vector.load %arg9[%c0_17, %c0_18] : memref<16x128xf32, #tpu.memory_space<vmem>>, vector<16x128xf32>
    tpu.vector_store %arg9[%c0_17, %c0_18], %48 {strides = array<i32>} : memref<16x128xf32, #tpu.memory_space<vmem>>, vector<16x128xf32>,
    %c8_i32_19 = arith.constant 8 : i32
    %50 = vector.broadcast %c8_i32_19 : i32 to vector<1x1x128xi32>
    %51 = arith.cmpi sge, %17, %50 : vector<1x1x128xi32>
    %c16_i32 = arith.constant 16 : i32
    %52 = vector.broadcast %c16_i32 : i32 to vector<1x1x128xi32>
    %53 = arith.cmpi slt, %17, %52 : vector<1x1x128xi32>
    %54 = arith.andi %51, %53 : vector<1x1x128xi1>
    %cst_20 = arith.constant 0.000000e+00 : bf16
    %55 = vector.shape_cast %54 : vector<1x1x128xi1> to vector<1x1x128xi1>
    %56 = vector.broadcast %55 : vector<1x1x128xi1> to vector<2x8x128xi1>
    %57 = vector.broadcast %cst_20 : bf16 to vector<2x8x128xbf16>
    %58 = arith.select %56, %12, %57 : vector<2x8x128xi1>, vector<2x8x128xbf16>
    %cst_21 = arith.constant 0.000000e+00 : bf16
    %59 = vector.shape_cast %54 : vector<1x1x128xi1> to vector<1x1x128xi1>
    %60 = vector.broadcast %59 : vector<1x1x128xi1> to vector<2x8x128xi1>
    %61 = vector.broadcast %cst_21 : bf16 to vector<2x8x128xbf16>
    %62 = arith.select %60, %16, %61 : vector<2x8x128xi1>, vector<2x8x128xbf16>
    "tpu.trace_start"() <{level = 10 : i32, message = "nld,nmd->nlm"}> : () -> ()
    %cst_22 = arith.constant dense<0.000000e+00> : vector<2x8x8xf32>
    %63 = tpu.matmul %58, %14, %cst_22 {dimension_numbers = #tpu.dot_dimension_numbers<[2], [2], [1], [1], [0, 0, 0, 1, 1, 1], [0], [0]>} : vector<2x8x128xbf16>, vector<2x8x128xbf16>, vector<2x8x8xf32> -> vector<2x8x8xf32>
    "tpu.trace_stop"() : () -> ()
    %cst_23 = arith.constant dense<0xFF800000> : vector<2x8xf32>
    %64 = vector.multi_reduction <maximumf>, %63, %cst_23 [2] : vector<2x8x8xf32> to vector<2x8xf32>
    %65 = vector.shape_cast %64 : vector<2x8xf32> to vector<2x8x1xf32>
    %66 = vector.broadcast %65 : vector<2x8x1xf32> to vector<2x8x8xf32>
    %67 = arith.subf %63, %66 : vector<2x8x8xf32>
    %68 = math.exp %67 : vector<2x8x8xf32>
    %cst_24 = arith.constant dense<0.000000e+00> : vector<2x8xf32>
    %69 = vector.multi_reduction <add>, %68, %cst_24 [2] : vector<2x8x8xf32> to vector<2x8xf32>
    %70 = vector.shape_cast %69 : vector<2x8xf32> to vector<2x8x1xf32>
    %71 = tpu.reciprocal %70 {approx = true} : vector<2x8x1xf32> -> vector<2x8x1xf32>
    %72 = vector.broadcast %71 : vector<2x8x1xf32> to vector<2x8x8xf32>
    %73 = arith.mulf %68, %72 : vector<2x8x8xf32>
    %74 = arith.truncf %73 : vector<2x8x8xf32> to vector<2x8x8xbf16>
    "tpu.trace_start"() <{level = 10 : i32, message = "nlm,nmd->nld"}> : () -> ()
    %cst_25 = arith.constant dense<0.000000e+00> : vector<2x8x128xf32>
    %75 = tpu.matmul %74, %62, %cst_25 {dimension_numbers = #tpu.dot_dimension_numbers<[2], [1], [1], [2], [0, 0, 0, 1, 1, 2], [0], [0]>} : vector<2x8x8xbf16>, vector<2x8x128xbf16>, vector<2x8x128xf32> -> vector<2x8x128xf32>
    "tpu.trace_stop"() : () -> ()
    %76 = vector.shape_cast %75 : vector<2x8x128xf32> to vector<16x128xf32>
    %c0_26 = arith.constant 0 : index
    %c0_27 = arith.constant 0 : index
    %77 = vector.load %arg9[%c0_26, %c0_27] : memref<16x128xf32, #tpu.memory_space<vmem>>, vector<16x128xf32>
    %78 = arith.addf %77, %76 : vector<16x128xf32>
    %c0_28 = arith.constant 0 : index
    %c0_29 = arith.constant 0 : index
    %79 = vector.load %arg9[%c0_28, %c0_29] : memref<16x128xf32, #tpu.memory_space<vmem>>, vector<16x128xf32>
    tpu.vector_store %arg9[%c0_28, %c0_29], %78 {strides = array<i32>} : memref<16x128xf32, #tpu.memory_space<vmem>>, vector<16x128xf32>,
    %c16_i32_30 = arith.constant 16 : i32
    %80 = vector.broadcast %c16_i32_30 : i32 to vector<1x1x128xi32>
    %81 = arith.cmpi sge, %17, %80 : vector<1x1x128xi32>
    %c24_i32 = arith.constant 24 : i32
    %82 = vector.broadcast %c24_i32 : i32 to vector<1x1x128xi32>
    %83 = arith.cmpi slt, %17, %82 : vector<1x1x128xi32>
    %84 = arith.andi %81, %83 : vector<1x1x128xi1>
    %cst_31 = arith.constant 0.000000e+00 : bf16
    %85 = vector.shape_cast %84 : vector<1x1x128xi1> to vector<1x1x128xi1>
    %86 = vector.broadcast %85 : vector<1x1x128xi1> to vector<2x8x128xi1>
    %87 = vector.broadcast %cst_31 : bf16 to vector<2x8x128xbf16>
    %88 = arith.select %86, %12, %87 : vector<2x8x128xi1>, vector<2x8x128xbf16>
    %cst_32 = arith.constant 0.000000e+00 : bf16
    %89 = vector.shape_cast %84 : vector<1x1x128xi1> to vector<1x1x128xi1>
    %90 = vector.broadcast %89 : vector<1x1x128xi1> to vector<2x8x128xi1>
    %91 = vector.broadcast %cst_32 : bf16 to vector<2x8x128xbf16>
    %92 = arith.select %90, %16, %91 : vector<2x8x128xi1>, vector<2x8x128xbf16>
    "tpu.trace_start"() <{level = 10 : i32, message = "nld,nmd->nlm"}> : () -> ()
    %cst_33 = arith.constant dense<0.000000e+00> : vector<2x8x8xf32>
    %93 = tpu.matmul %88, %14, %cst_33 {dimension_numbers = #tpu.dot_dimension_numbers<[2], [2], [1], [1], [0, 0, 0, 1, 1, 1], [0], [0]>} : vector<2x8x128xbf16>, vector<2x8x128xbf16>, vector<2x8x8xf32> -> vector<2x8x8xf32>
    "tpu.trace_stop"() : () -> ()
    %cst_34 = arith.constant dense<0xFF800000> : vector<2x8xf32>
    %94 = vector.multi_reduction <maximumf>, %93, %cst_34 [2] : vector<2x8x8xf32> to vector<2x8xf32>
    %95 = vector.shape_cast %94 : vector<2x8xf32> to vector<2x8x1xf32>
    %96 = vector.broadcast %95 : vector<2x8x1xf32> to vector<2x8x8xf32>
    %97 = arith.subf %93, %96 : vector<2x8x8xf32>
    %98 = math.exp %97 : vector<2x8x8xf32>
    %cst_35 = arith.constant dense<0.000000e+00> : vector<2x8xf32>
    %99 = vector.multi_reduction <add>, %98, %cst_35 [2] : vector<2x8x8xf32> to vector<2x8xf32>
    %100 = vector.shape_cast %99 : vector<2x8xf32> to vector<2x8x1xf32>
    %101 = tpu.reciprocal %100 {approx = true} : vector<2x8x1xf32> -> vector<2x8x1xf32>
    %102 = vector.broadcast %101 : vector<2x8x1xf32> to vector<2x8x8xf32>
    %103 = arith.mulf %98, %102 : vector<2x8x8xf32>
    %104 = arith.truncf %103 : vector<2x8x8xf32> to vector<2x8x8xbf16>
    "tpu.trace_start"() <{level = 10 : i32, message = "nlm,nmd->nld"}> : () -> ()
    %cst_36 = arith.constant dense<0.000000e+00> : vector<2x8x128xf32>
    %105 = tpu.matmul %104, %92, %cst_36 {dimension_numbers = #tpu.dot_dimension_numbers<[2], [1], [1], [2], [0, 0, 0, 1, 1, 2], [0], [0]>} : vector<2x8x8xbf16>, vector<2x8x128xbf16>, vector<2x8x128xf32> -> vector<2x8x128xf32>
    "tpu.trace_stop"() : () -> ()
    %106 = vector.shape_cast %105 : vector<2x8x128xf32> to vector<16x128xf32>
    %c0_37 = arith.constant 0 : index
    %c0_38 = arith.constant 0 : index
    %107 = vector.load %arg9[%c0_37, %c0_38] : memref<16x128xf32, #tpu.memory_space<vmem>>, vector<16x128xf32>
    %108 = arith.addf %107, %106 : vector<16x128xf32>
    %c0_39 = arith.constant 0 : index
    %c0_40 = arith.constant 0 : index
    %109 = vector.load %arg9[%c0_39, %c0_40] : memref<16x128xf32, #tpu.memory_space<vmem>>, vector<16x128xf32>
    tpu.vector_store %arg9[%c0_39, %c0_40], %108 {strides = array<i32>} : memref<16x128xf32, #tpu.memory_space<vmem>>, vector<16x128xf32>,
    %c24_i32_41 = arith.constant 24 : i32
    %110 = vector.broadcast %c24_i32_41 : i32 to vector<1x1x128xi32>
    %111 = arith.cmpi sge, %17, %110 : vector<1x1x128xi32>
    %c32_i32 = arith.constant 32 : i32
    %112 = vector.broadcast %c32_i32 : i32 to vector<1x1x128xi32>
    %113 = arith.cmpi slt, %17, %112 : vector<1x1x128xi32>
    %114 = arith.andi %111, %113 : vector<1x1x128xi1>
    %cst_42 = arith.constant 0.000000e+00 : bf16
    %115 = vector.shape_cast %114 : vector<1x1x128xi1> to vector<1x1x128xi1>
    %116 = vector.broadcast %115 : vector<1x1x128xi1> to vector<2x8x128xi1>
    %117 = vector.broadcast %cst_42 : bf16 to vector<2x8x128xbf16>
    %118 = arith.select %116, %12, %117 : vector<2x8x128xi1>, vector<2x8x128xbf16>
    %cst_43 = arith.constant 0.000000e+00 : bf16
    %119 = vector.shape_cast %114 : vector<1x1x128xi1> to vector<1x1x128xi1>
    %120 = vector.broadcast %119 : vector<1x1x128xi1> to vector<2x8x128xi1>
    %121 = vector.broadcast %cst_43 : bf16 to vector<2x8x128xbf16>
    %122 = arith.select %120, %16, %121 : vector<2x8x128xi1>, vector<2x8x128xbf16>
    "tpu.trace_start"() <{level = 10 : i32, message = "nld,nmd->nlm"}> : () -> ()
    %cst_44 = arith.constant dense<0.000000e+00> : vector<2x8x8xf32>
    %123 = tpu.matmul %118, %14, %cst_44 {dimension_numbers = #tpu.dot_dimension_numbers<[2], [2], [1], [1], [0, 0, 0, 1, 1, 1], [0], [0]>} : vector<2x8x128xbf16>, vector<2x8x128xbf16>, vector<2x8x8xf32> -> vector<2x8x8xf32>
    "tpu.trace_stop"() : () -> ()
    %cst_45 = arith.constant dense<0xFF800000> : vector<2x8xf32>
    %124 = vector.multi_reduction <maximumf>, %123, %cst_45 [2] : vector<2x8x8xf32> to vector<2x8xf32>
    %125 = vector.shape_cast %124 : vector<2x8xf32> to vector<2x8x1xf32>
    %126 = vector.broadcast %125 : vector<2x8x1xf32> to vector<2x8x8xf32>
    %127 = arith.subf %123, %126 : vector<2x8x8xf32>
    %128 = math.exp %127 : vector<2x8x8xf32>
    %cst_46 = arith.constant dense<0.000000e+00> : vector<2x8xf32>
    %129 = vector.multi_reduction <add>, %128, %cst_46 [2] : vector<2x8x8xf32> to vector<2x8xf32>
    %130 = vector.shape_cast %129 : vector<2x8xf32> to vector<2x8x1xf32>
    %131 = tpu.reciprocal %130 {approx = true} : vector<2x8x1xf32> -> vector<2x8x1xf32>
    %132 = vector.broadcast %131 : vector<2x8x1xf32> to vector<2x8x8xf32>
    %133 = arith.mulf %128, %132 : vector<2x8x8xf32>
    %134 = arith.truncf %133 : vector<2x8x8xf32> to vector<2x8x8xbf16>
    "tpu.trace_start"() <{level = 10 : i32, message = "nlm,nmd->nld"}> : () -> ()
    %cst_47 = arith.constant dense<0.000000e+00> : vector<2x8x128xf32>
    %135 = tpu.matmul %134, %122, %cst_47 {dimension_numbers = #tpu.dot_dimension_numbers<[2], [1], [1], [2], [0, 0, 0, 1, 1, 2], [0], [0]>} : vector<2x8x8xbf16>, vector<2x8x128xbf16>, vector<2x8x128xf32> -> vector<2x8x128xf32>
    "tpu.trace_stop"() : () -> ()
    %136 = vector.shape_cast %135 : vector<2x8x128xf32> to vector<16x128xf32>
    %c0_48 = arith.constant 0 : index
    %c0_49 = arith.constant 0 : index
    %137 = vector.load %arg9[%c0_48, %c0_49] : memref<16x128xf32, #tpu.memory_space<vmem>>, vector<16x128xf32>
    %138 = arith.addf %137, %136 : vector<16x128xf32>
    %c0_50 = arith.constant 0 : index
    %c0_51 = arith.constant 0 : index
    %139 = vector.load %arg9[%c0_50, %c0_51] : memref<16x128xf32, #tpu.memory_space<vmem>>, vector<16x128xf32>
    tpu.vector_store %arg9[%c0_50, %c0_51], %138 {strides = array<i32>} : memref<16x128xf32, #tpu.memory_space<vmem>>, vector<16x128xf32>,
    %c0_52 = arith.constant 0 : index
    %c0_53 = arith.constant 0 : index
    %140 = vector.load %arg9[%c0_52, %c0_53] : memref<16x128xf32, #tpu.memory_space<vmem>>, vector<16x128xf32>
    %141 = arith.truncf %140 : vector<16x128xf32> to vector<16x128xbf16>
    %c0_54 = arith.constant 0 : index
    %c0_55 = arith.constant 0 : index
    %142 = vector.load %arg4[%c0_54, %c0_55] : memref<128x128xbf16, #tpu.memory_space<vmem>>, vector<128x128xbf16>
    %cst_56 = arith.constant dense<0.000000e+00> : vector<16x128xf32>
    %143 = tpu.matmul %141, %142, %cst_56 {dimension_numbers = #tpu.dot_dimension_numbers<[1], [0], [0], [1], [0, 0, 1, 1], [], []>} : vector<16x128xbf16>, vector<128x128xbf16>, vector<16x128xf32> -> vector<16x128xf32>
    %c0_57 = arith.constant 0 : index
    %c0_58 = arith.constant 0 : index
    %144 = vector.load %arg5[%c0_57, %c0_58] : memref<1x128xf32, #tpu.memory_space<vmem>>, vector<1x128xf32>
    %145 = vector.broadcast %144 : vector<1x128xf32> to vector<16x128xf32>
    %146 = arith.addf %143, %145 : vector<16x128xf32>
    %147 = arith.addf %146, %2 : vector<16x128xf32>
    %148 = arith.truncf %147 : vector<16x128xf32> to vector<16x128xbf16>
    %c0_59 = arith.constant 0 : index
    %c0_60 = arith.constant 0 : index
    %149 = vector.load %arg6[%c0_59, %c0_60] : memref<128x128xbf16, #tpu.memory_space<vmem>>, vector<128x128xbf16>
    %cst_61 = arith.constant dense<0.000000e+00> : vector<16x128xf32>
    %150 = tpu.matmul %148, %149, %cst_61 {dimension_numbers = #tpu.dot_dimension_numbers<[1], [0], [0], [1], [0, 0, 1, 1], [], []>} : vector<16x128xbf16>, vector<128x128xbf16>, vector<16x128xf32> -> vector<16x128xf32>
    %151 = arith.truncf %150 : vector<16x128xf32> to vector<16x128xbf16>
    %c0_62 = arith.constant 0 : index
    %c0_63 = arith.constant 0 : index
    %152 = vector.load %arg7[%c0_62, %c0_63] : memref<128x128xbf16, #tpu.memory_space<vmem>>, vector<128x128xbf16>
    %cst_64 = arith.constant dense<0.000000e+00> : vector<16x128xf32>
    %153 = tpu.matmul %151, %152, %cst_64 {dimension_numbers = #tpu.dot_dimension_numbers<[1], [0], [0], [1], [0, 0, 1, 1], [], []>} : vector<16x128xbf16>, vector<128x128xbf16>, vector<16x128xf32> -> vector<16x128xf32>
    %154 = arith.addf %153, %147 : vector<16x128xf32>
    %155 = vector.shape_cast %154 : vector<16x128xf32> to vector<2x8x128xf32>
    %c0_65 = arith.constant 0 : index
    %c0_66 = arith.constant 0 : index
    %c0_67 = arith.constant 0 : index
    %156 = vector.load %arg8[%c0_65, %c0_66, %c0_67] : memref<2x8x128xf32, #tpu.memory_space<vmem>>, vector<2x8x128xf32>
    tpu.vector_store %arg8[%c0_65, %c0_66, %c0_67], %155 {strides = array<i32>} : memref<2x8x128xf32, #tpu.memory_space<vmem>>, vector<2x8x128xf32>,
    return
  }
  func.func @transform_0(%arg0: i32) -> (i32, i32, i32) {
    %c0_i32 = arith.constant 0 : i32
    %c0_i32_0 = arith.constant 0 : i32
    %c0_i32_1 = arith.constant 0 : i32
    return %arg0, %c0_i32, %c0_i32_0 : i32, i32, i32
  }
  func.func @transform_1(%arg0: i32) -> (i32, i32) {
    %c0_i32 = arith.constant 0 : i32
    %c0_i32_0 = arith.constant 0 : i32
    %c0_i32_1 = arith.constant 0 : i32
    return %c0_i32, %c0_i32_0 : i32, i32
  }
  func.func @transform_2(%arg0: i32) -> (i32, i32) {
    %c0_i32 = arith.constant 0 : i32
    %c0_i32_0 = arith.constant 0 : i32
    %c0_i32_1 = arith.constant 0 : i32
    return %c0_i32, %c0_i32_0 : i32, i32
  }
  func.func @transform_3(%arg0: i32) -> (i32, i32) {
    %c0_i32 = arith.constant 0 : i32
    %c0_i32_0 = arith.constant 0 : i32
    %c0_i32_1 = arith.constant 0 : i32
    return %c0_i32, %c0_i32_0 : i32, i32
  }
  func.func @transform_4(%arg0: i32) -> (i32, i32) {
    %c0_i32 = arith.constant 0 : i32
    %c0_i32_0 = arith.constant 0 : i32
    %c0_i32_1 = arith.constant 0 : i32
    return %c0_i32, %c0_i32_0 : i32, i32
  }
  func.func @transform_5(%arg0: i32) -> (i32, i32) {
    %c0_i32 = arith.constant 0 : i32
    %c0_i32_0 = arith.constant 0 : i32
    %c0_i32_1 = arith.constant 0 : i32
    return %c0_i32, %c0_i32_0 : i32, i32
  }
  func.func @transform_6(%arg0: i32) -> (i32, i32) {
    %c0_i32 = arith.constant 0 : i32
    %c0_i32_0 = arith.constant 0 : i32
    %c0_i32_1 = arith.constant 0 : i32
    return %c0_i32, %c0_i32_0 : i32, i32
  }
  func.func @transform_7(%arg0: i32) -> (i32, i32, i32) {
    %c0_i32 = arith.constant 0 : i32
    %c0_i32_0 = arith.constant 0 : i32
    %c0_i32_1 = arith.constant 0 : i32
    return %arg0, %c0_i32, %c0_i32_0 : i32, i32, i32
  }
}

</mosaic_0001>

<bundles_post_ra>
// kernel: transformer_layer_pallas.1
= control target key start
LH: loop header
LB: loop body
LE: loop exit
PB: predicated region body
PF: predicated region fallthrough
CT: control target
= control target key end

     0   :  { %12 = vsyncpa [#allocation4], 0  ;;  %s2385_s0 = inlined_call_operand.vmem [shape: bf16[2,8,128], index: 0, kind: input, shape index: {}]   ;;  %s2386_s1 = inlined_call_operand.hbm [shape: bf16[128,384], index: 1, kind: input, shape index: {}]   ;;  %s2387_s2 = inlined_call_operand.vmem [shape: f32[1,384], index: 2, kind: input, shape index: {}]   ;;  %s2388_s3 = inlined_call_operand.hbm [shape: bf16[128,128], index: 3, kind: input, shape index: {}]   ;;  %s2389_s4 = inlined_call_operand.vmem [shape: f32[1,128], index: 4, kind: input, shape index: {}]   ;;  %s2390_s5 = inlined_call_operand.hbm [shape: bf16[128,128], index: 5, kind: input, shape index: {}]   ;;  %s2391_s6 = inlined_call_operand.hbm [shape: bf16[128,128], index: 6, kind: input, shape index: {}]   ;;  %s2392_s7 = inlined_call_operand.vmem [shape: f32[2,8,128], index: 7, kind: output, shape index: {}]  }
   0x1   :  { %13 = vsyncpa [#allocation6], 0 }
   0x2   :  { %14 = vsyncpa [#allocation9], 0  ;;  %s2070_s24 = smov [#allocation5]  }
   0x3   :  { %s36_s25 = sshll.u32 %s2070_s24, 4  ;;  %s37_s25 = int_to_ptr.vmem [resolvable:$true] %s36_s25 }
   0x4   :  { %s1992_s26 = scalar_lea.vmem %s37_s25, 1024  ;;  %p1997_p1 = scmp.lt.s32.totalorder %s37_s25, %s37_s25 }
   0x5   :  { %p1993_p0 = scmp.ne.s32.totalorder %s37_s25, %s1992_s26  ;;  %p1998_p2 = scmp.lt.s32.totalorder %s1992_s26, %s1992_s26 }
   0x7   :  { %p1999_p3 = por %p1998_p2, %p1997_p1 }
   0x9   :  { %p2000_p4 = pnand %p1999_p3, %p1993_p0 }
   0xb   :  { %2003 = shalt.err (!%p2000_p4)
}
   0xc   :  { %s2071_s27 = smov 64   ;;  %s2072_s28 = smov 4  }
   0xd   :  { %42 = dma.hbm_to_vmem [thread:$0]  %s2388_s3, 1024, %s37_s25, [#allocation6], %s2071_s27, %s2071_s27, %s2072_s28  }
   0xe   :  { %s2073_s8 = smov [#allocation3]  }
   0xf   :  { %s22_s9 = sshll.u32 %s2073_s8, 4  ;;  %s23_s9 = int_to_ptr.vmem [resolvable:$true] %s22_s9 }
  0x10   :  { %s2012_s10 = scalar_lea.vmem %s23_s9, 3072  ;;  %p2017_p6 = scmp.lt.s32.totalorder %s23_s9, %s23_s9 }
  0x11   :  { %p2013_p5 = scmp.ne.s32.totalorder %s23_s9, %s2012_s10  ;;  %p2018_p7 = scmp.lt.s32.totalorder %s2012_s10, %s2012_s10 }
  0x13   :  { %p2019_p8 = por %p2018_p7, %p2017_p6 }
  0x15   :  { %p2020_p9 = pnand %p2019_p8, %p2013_p5 }
  0x17   :  { %2023 = shalt.err (!%p2020_p9)
}
  0x18   :  { %s2074_s11 = smov 192   ;;  %s2075_s12 = smov 12  }
  0x19   :  { %28 = dma.hbm_to_vmem [thread:$0]  %s2386_s1, 3072, %s23_s9, [#allocation4], %s2074_s11, %s2074_s11, %s2075_s12  }
  0x1a   :  { %s2076_s15 = smov [#allocation7]   ;;  %s2077_s17 = smov [#allocation8]  }
  0x1b   :  { %s50_s16 = sshll.u32 %s2076_s15, 4  ;;  %s62_s3 = sshll.u32 %s2077_s17, 4  ;;  %s51_s16 = int_to_ptr.vmem [resolvable:$true] %s50_s16  ;;  %s63_s3 = int_to_ptr.vmem [resolvable:$true] %s62_s3 }
  0x1c   :  { %s2032_s18 = scalar_lea.vmem %s51_s16, 1024  ;;  %p2037_p11 = scmp.lt.s32.totalorder %s51_s16, %s51_s16 }
  0x1d   :  { %p2033_p10 = scmp.ne.s32.totalorder %s51_s16, %s2032_s18  ;;  %p2038_p12 = scmp.lt.s32.totalorder %s2032_s18, %s2032_s18 }
  0x1f   :  { %p2039_p13 = por %p2038_p12, %p2037_p11 }
  0x21   :  { %p2040_p0 = pnand %p2039_p13, %p2033_p10 }
  0x23   :  { %2043 = shalt.err (!%p2040_p0)
}
  0x24   :  { %56 = dma.hbm_to_vmem [thread:$0]  %s2390_s5, 1024, %s51_s16, [#allocation6], %s2071_s27, %s2071_s27, %s2072_s28  }
  0x25   :  { %s2052_s1 = scalar_lea.vmem %s63_s3, 1024  ;;  %p2057_p2 = scmp.lt.s32.totalorder %s63_s3, %s63_s3 }
  0x26   :  { %p2053_p1 = scmp.ne.s32.totalorder %s63_s3, %s2052_s1  ;;  %p2058_p3 = scmp.lt.s32.totalorder %s2052_s1, %s2052_s1 }
  0x28   :  { %p2059_p4 = por %p2058_p3, %p2057_p2 }
  0x2a   :  { %p2060_p5 = pnand %p2059_p4, %p2053_p1 }
  0x2c   :  { %2063 = shalt.err (!%p2060_p5)
}
  0x2d   :  { %68 = dma.hbm_to_vmem [thread:$0]  %s2391_s6, 1024, %s63_s3, [#allocation9], %s2071_s27, %s2071_s27, %s2072_s28  }
  0x2e   :  { %2064 = dma.done.wait [#allocation4], 3072  }
  0x2f   :  { %2065 = vsyncadd [#allocation4], 4294964224 }
  0x30   :  { %2066 = dma.done.wait [#allocation6], 2048  }
  0x31   :  { %2067 = vsyncadd [#allocation6], 4294965248 }
  0x32   :  { %2068 = dma.done.wait [#allocation9], 1024  }
  0x33   :  { %2069 = vsyncadd [#allocation9], 4294966272  ;;  %v2078_v0 = vmov 0   ;;  %v2079_v1 = vmov 0.0   ;;  %v1894_v2 = vld [vmem:[#allocation3 + $0xac] ss:$12 sps:$4 sm:$0xff]   ;;  %v120_v27 = vlaneseq }
  0x34   :  { %301 = vmatprep.mubr.bf16.mxu0 %v2078_v0  ;;  %1707 = vmatprep.subr.bf16.mxu1 %v2079_v1  ;;  %v1896_v3 = vld [vmem:[#allocation3 + $0xa8] ss:$12 sps:$4 sm:$0xff]   ;;  %v1899_v5 = vld [vmem:[#allocation3 + $0x90] ss:$12 sps:$4 sm:$0xff]   ;;  %v1902_v7 = vld [vmem:[#allocation3 + $0x78] ss:$12 sps:$4 sm:$0xff]  }
  0x35   :  { %269 = vmatprep.subr.bf16.mxu0 %v1894_v2  ;;  %v1897_v4 = vld [vmem:[#allocation3 + $0x94] ss:$12 sps:$4 sm:$0xff]   ;;  %v1900_v6 = vld [vmem:[#allocation3 + $0x7c] ss:$12 sps:$4 sm:$0xff]   ;;  %v1903_v8 = vld [vmem:[#allocation3 + $0x64] ss:$12 sps:$4 sm:$0xff]  }
  0x36   :  { %270 = vmatpush1.bf16.msra.mxu0 %v1896_v3  ;;  %v1905_v9 = vld [vmem:[#allocation3 + $0x60] ss:$12 sps:$4 sm:$0xff]   ;;  %v1919_v10 = vld [vmem:[#allocation3 + $0xb0] ss:$12 sps:$4 sm:$0xff]   ;;  %v1920_v12 = vld [vmem:[#allocation3 + $0x98] ss:$12 sps:$4 sm:$0xff]  }
  0x37   :  { %271 = vmatprep.subr.bf16.mxu0 %v1897_v4  ;;  %v1906_v11 = vld [vmem:[#allocation3 + $0x4c] ss:$12 sps:$4 sm:$0xff]   ;;  %1708 = vmatpush3.bf16.msra.mxu1 %v1919_v10  ;;  %v1908_v13 = vld [vmem:[#allocation3 + $0x48] ss:$12 sps:$4 sm:$0xff]   ;;  %v1911_v15 = vld [vmem:[#allocation3 + $0x30] ss:$12 sps:$4 sm:$0xff]  }
  0x38   :  { %1709 = vmatprep.subr.bf16.mxu1 %v2079_v1  ;;  %v1909_v14 = vld [vmem:[#allocation3 + $0x34] ss:$12 sps:$4 sm:$0xff]   ;;  %v1912_v17 = vld [vmem:[#allocation3 + $0x1c] ss:$12 sps:$4 sm:$0xff]   ;;  %v1914_v19 = vld [vmem:[#allocation3 + $0x18] ss:$12 sps:$4 sm:$0xff]  }
  0x39   :  { %v1921_v16 = vld [vmem:[#allocation3 + $0x80] ss:$12 sps:$4 sm:$0xff]   ;;  %v1922_v18 = vld [vmem:[#allocation3 + $0x68] ss:$12 sps:$4 sm:$0xff]   ;;  %v1915_v20 = vld [vmem:[#allocation3 + $0x4] ss:$12 sps:$4 sm:$0xff]  }
  0x3a   :  { %272 = vmatpush1.bf16.msra.mxu0 %v1899_v5  ;;  %v1923_v21 = vld [vmem:[#allocation3 + $0x50] ss:$12 sps:$4 sm:$0xff]   ;;  %v1917_v22 = vld [vmem:[#allocation3] ss:$12 sps:$4 sm:$0xff]   ;;  %v1924_v24 = vld [vmem:[#allocation3 + $0x38] ss:$12 sps:$4 sm:$0xff]  }
  0x3b   :  { %273 = vmatprep.subr.bf16.mxu0 %v1900_v6  ;;  %1710 = vmatpush3.bf16.msra.mxu1 %v1920_v12  ;;  %v2149_v23 = vld [vmem:[%s2385_s0] sm:$0xff]   ;;  %v1926_v26 = vld [vmem:[#allocation3 + $0x8] ss:$12 sps:$4 sm:$0xff]   ;;  %vm2080_vm0 = vmmov 0   ;;  %v121_v28 = vshrl.u32 %v120_v27, 7  ;;  %v378_v34 = vand.u32 127, %v120_v27 }
  0x3c   :  { %1711 = vmatprep.subr.bf16.mxu1 %v2079_v1  ;;  %v1925_v25 = vld [vmem:[#allocation3 + $0x20] ss:$12 sps:$4 sm:$0xff]   ;;  %1723 = vmatprep.mubr.msk.bf16.mxu1 %vm2080_vm0, %v2079_v1  ;;  %vm499_vm13 = vcmask 1043456  }
  0x3d   :  { %v126_v29 = vsub.s32 1, %v121_v28  ;;  %v122_v30 = vsub.s32 0, %v121_v28  ;;  %v118_v31 = vld [vmem:[%s2387_s2] sm:$0x7]  ;;  %vm595_vm1 = vcmp.ge.s32.totalorder %v378_v34, 8  ;;  %vm596_vm2 = vcmp.lt.s32.totalorder %v378_v34, 16 }
  0x3e   :  { %274 = vmatpush1.bf16.msra.mxu0 %v1902_v7  ;;  %vm382_vm3 = vcmp.lt.s32.totalorder %v378_v34, 8  ;;  %vm597_vm4 = vmand %vm595_vm1, %vm596_vm2  ;;  %v130_v52 = vsub.s32 2, %v121_v28  ;;  %vm807_vm7 = vcmp.ge.s32.totalorder %v378_v34, 16  ;;  %vm808_vm8 = vcmp.lt.s32.totalorder %v378_v34, 24 }
  0x3f   :  { %275 = vmatprep.subr.bf16.mxu0 %v1903_v8  ;;  %1712 = vmatpush3.bf16.msra.mxu1 %v1921_v16  ;;  %v127_v32 = vrot.slane %v118_v31, %v126_v29  ;;  %v123_v35 = vrot.slane %v118_v31, %v122_v30  ;;  %vm2176_vm5 = vmpackc.low %vm382_vm3, %vm382_vm3  ;;  %vm1019_vm9 = vcmp.ge.s32.totalorder %v378_v34, 24  ;;  %vm1020_vm10 = vcmp.lt.s32.totalorder %v378_v34, 32 }
  0x40   :  { %1713 = vmatprep.subr.bf16.mxu1 %v2079_v1  ;;  %vm2180_vm6 = vmpackc.low %vm597_vm4, %vm597_vm4  ;;  %v131_v53 = vrot.slane %v118_v31, %v130_v52  ;;  %vm471_vm1 = vcmask 64512  }
  0x41   :  { %vm809_vm11 = vmand %vm807_vm7, %vm808_vm8 }
  0x42   :  { %276 = vmatpush1.bf16.msra.mxu0 %v1905_v9  ;;  %vm1021_vm12 = vmand %vm1019_vm9, %vm1020_vm10 }
  0x43   :  { %277 = vmatprep.subr.bf16.mxu0 %v1906_v11  ;;  %1714 = vmatpush3.bf16.msra.mxu1 %v1922_v18  ;;  %vm2211_vm14 = vmpackc.low %vm809_vm11, %vm809_vm11 }
  0x44   :  { %1715 = vmatprep.subr.bf16.mxu1 %v2079_v1  ;;  %vm2222_vm15 = vmpackc.low %vm1021_vm12, %vm1021_vm12 }
  0x46   :  { %278 = vmatpush1.bf16.msra.mxu0 %v1908_v13 }
  0x47   :  { %279 = vmatprep.subr.bf16.mxu0 %v1909_v14  ;;  %1716 = vmatpush3.bf16.msra.mxu1 %v1923_v21 }
  0x48   :  { %1717 = vmatprep.subr.bf16.mxu1 %v2079_v1 }
  0x4a   :  { %280 = vmatpush1.bf16.msra.mxu0 %v1911_v15 }
  0x4b   :  { %281 = vmatprep.subr.bf16.mxu0 %v1912_v17  ;;  %1718 = vmatpush3.bf16.msra.mxu1 %v1924_v24 }
  0x4c   :  { %1719 = vmatprep.subr.bf16.mxu1 %v2079_v1 }
  0x4e   :  { %282 = vmatpush1.bf16.msra.mxu0 %v1914_v19 }
  0x4f   :  { %283 = vmatprep.subr.bf16.mxu0 %v1915_v20  ;;  %1720 = vmatpush3.bf16.msra.mxu1 %v1925_v25 }
  0x50   :  { %1721 = vmatprep.subr.bf16.mxu1 %v2079_v1 }
  0x52   :  { %284 = vmatpush1.bf16.msra.mxu0 %v1917_v22 }
  0x53   :  { %1751 = vmatprep.subr.bf16.mxu0 %v2079_v1  ;;  %1722 = vmatpush3.bf16.msra.mxu1 %v1926_v26 }
  0x54   :  { %1727 = vmatprep.subr.bf16.mxu1 %v2079_v1 }
  0x55   :  { %302 = vmatmul.mubr.bf16.vlgmr.msra.gmra.mxu0 %v2149_v23 }
  0x56   :  { %1753 = vmatprep.mubr.msk.bf16.mxu0 %vm2080_vm0, %v2079_v1  ;;  %1724 = vmatmul.mubr.bf16.vlgmr.msra.gmra.mxu1 %v2149_v23 }
  0x57   :  { %1729 = vmatprep.mubr.msk.bf16.mxu1 %vm2080_vm0, %v2079_v1 }
 0x115   :  { %v303_v33 = vpop.f32.mrf.mxu0 }
 0x116   :  { %v304_v39 = vadd.f32 %v303_v33, %v123_v35  ;;  %v346_v54 = vpop.f32.mrf.mxu1 }
 0x117   :  { %v305_v36 = vpop.f32.mrf.mxu0  ;;  %v347_v56 = vadd.f32 %v346_v54, %v131_v53 }
 0x118   :  { %v306_v37 = vadd.f32 %v305_v36, %v127_v32  ;;  %v2174_v42 = vpack.c.bf16 %v304_v39, %v304_v39  ;;  %v1725_v55 = vpop.f32.mrf.mxu1 }
 0x119   :  { %v307_v38 = vpop.f32.mrf.mxu0  ;;  %v1637_v60 = vpack.c.bf16 %v347_v56, %v347_v56 }
 0x11a   :  { %v2168_v40 = vpack.c.bf16 %v306_v37, %v306_v37  ;;  %v308_v46 = vadd.f32 %v307_v38, %v123_v35  ;;  %v387_v48 = vsel %vm2176_vm5, %v2174_v42, 0  ;;  %v601_v49 = vsel %vm2180_vm6, %v2174_v42, 0  ;;  %v349_v57 = vpop.f32.mrf.mxu1 }
 0x11b   :  { %v309_v41 = vpop.f32.mrf.mxu0  ;;  %v350_v58 = vadd.f32 %v349_v57, %v131_v53  ;;  %v389_v62 = vsel %vm2176_vm5, %v1637_v60, 0  ;;  %v603_v63 = vsel %vm2180_vm6, %v1637_v60, 0  ;;  %v815_v9 = vsel %vm2211_vm14, %v1637_v60, 0 }
 0x11c   :  { %1728 = vmatpush3.bf16.xpose.msra.mxu1 %v2168_v40  ;;  %1752 = vmatpush3.bf16.xpose.msra.mxu0 %v2168_v40  ;;  %v310_v43 = vadd.f32 %v309_v41, %v127_v32  ;;  %v2198_v50 = vpack.c.bf16 %v308_v46, %v308_v46  ;;  %v1726_v59 = vpop.f32.mrf.mxu1  ;;  %v501_v3 = vsel %vm499_vm13, %v389_v62, 0  ;;  %v713_v4 = vsel %vm499_vm13, %v603_v63, 0 }
 0x11d   :  { %1733 = vmatprep.subr.bf16.mxu1 %v2079_v1  ;;  %1763 = vmatprep.subr.bf16.mxu0 %v2079_v1  ;;  %v1638_v61 = vpack.c.bf16 %v350_v58, %v350_v58  ;;  %v1027_v11 = vsel %vm2222_vm15, %v1637_v60, 0  ;;  %v2238_v12 = vsel %vm499_vm13, %v815_v9, 0 }
 0x11e   :  { %v2184_v47 = vpack.c.bf16 %v310_v43, %v310_v43  ;;  %v388_v51 = vsel %vm2176_vm5, %v2198_v50, 0  ;;  %v2244_v14 = vsel %vm499_vm13, %v1027_v11, 0 }
 0x11f   :  { %v390_v0 = vsel %vm2176_vm5, %v1638_v61, 0  ;;  %v604_v6 = vsel %vm2180_vm6, %v1638_v61, 0  ;;  %v816_v10 = vsel %vm2211_vm14, %v1638_v61, 0  ;;  %v1028_v15 = vsel %vm2222_vm15, %v1638_v61, 0 }
 0x120   :  { %v2218_v5 = vsel %vm499_vm13, %v390_v0, 0  ;;  %v2227_v8 = vsel %vm499_vm13, %v604_v6, 0  ;;  %v2241_v13 = vsel %vm499_vm13, %v816_v10, 0  ;;  %v2249_v16 = vsel %vm499_vm13, %v1028_v15, 0 }
 0x123   :  { %1730 = vmatmul.mubr.bf16.vlgmr.msra.gmra.mxu1 %v387_v48  ;;  %1754 = vmatmul.mubr.bf16.vlgmr.msra.gmra.mxu0 %v601_v49 }
 0x124   :  { %1734 = vmatpush3.bf16.xpose.msra.mxu1 %v2184_v47  ;;  %1735 = vmatprep.mubr.msk.bf16.mxu1 %vm2080_vm0, %v2079_v1 }
 0x125   :  { %1739 = vmatprep.subr.bf16.mxu1 %v2079_v1  ;;  %1765 = vmatprep.mubr.msk.bf16.mxu0 %vm2080_vm0, %v2079_v1 }
 0x126   :  { %1764 = vmatpush3.bf16.msra.mxu0 %v713_v4  ;;  %v813_v4 = vsel %vm2211_vm14, %v2174_v42, 0 }
 0x127   :  { %1775 = vmatprep.subr.bf16.mxu0 %v2079_v1 }
 0x12b   :  { %1736 = vmatmul.mubr.bf16.vlgmr.msra.gmra.mxu1 %v388_v51 }
 0x12c   :  { %1741 = vmatprep.mubr.msk.bf16.mxu1 %vm2080_vm0, %v2079_v1  ;;  %1740 = vmatpush3.bf16.msra.mxu1 %v501_v3  ;;  %v602_v3 = vsel %vm2180_vm6, %v2198_v50, 0 }
 0x12d   :  { %1745 = vmatprep.subr.bf16.mxu1 %v2079_v1 }
 0x1e3   :  { %v425_v17 = vpop.f32.mrf.mxu1  ;;  %v639_v18 = vpop.f32.mrf.mxu0 }
 0x1e4   :  { %v472_v19 = vsel %vm471_vm1, %v425_v17, -inf  ;;  %v685_v31 = vsel %vm471_vm1, %v639_v18, -inf }
 0x1e5   :  { %v1755_v20 = vpop.f32.mrf.mxu0  ;;  %473 = vmax.xlane.f32.xlu0 %v472_v19  ;;  %v1731_v21 = vpop.f32.mrf.mxu1 }
 0x1e7   :  { %v428_v22 = vpop.f32.mrf.mxu1  ;;  %v642_v24 = vpop.f32.mrf.mxu0 }
 0x1e9   :  { %v1732_v25 = vpop.f32.mrf.mxu1  ;;  %v1756_v26 = vpop.f32.mrf.mxu0 }
 0x1eb   :  { %v465_v27 = vpop.f32.mrf.mxu1 }
 0x1ec   :  { %v475_v28 = vsel %vm471_vm1, %v465_v27, -inf }
 0x1ed   :  { %476 = vmax.xlane.f32.xlu0 %v475_v28  ;;  %v1737_v29 = vpop.f32.mrf.mxu1 }
 0x1ef   :  { %v468_v30 = vpop.f32.mrf.mxu1 }
 0x1f1   :  { %686 = vmax.xlane.f32.xlu0 %v685_v31  ;;  %v1738_v32 = vpop.f32.mrf.mxu1 }
 0x26e   :  { %v474_v33 = vpop.xlane.xlu0 %473 }
 0x26f   :  { %v478_v34 = vsub.f32 %v425_v17, %v474_v33 }
 0x271   :  { %v480_v35 = vmul.f32 1.442695, %v478_v34 }
 0x273   :  { %1952 = vpow2.f32 %v480_v35 }
 0x276   :  { %v477_v36 = vpop.xlane.xlu0 %476 }
 0x277   :  { %v479_v37 = vsub.f32 %v465_v27, %v477_v36 }
 0x279   :  { %v482_v38 = vmul.f32 1.442695, %v479_v37 }
 0x27a   :  { %v687_v39 = vpop.xlane.xlu0 %686 }
 0x27b   :  { %1954 = vpow2.f32 %v482_v38  ;;  %v691_v41 = vsub.f32 %v639_v18, %v687_v39 }
 0x27d   :  { %v693_v43 = vmul.f32 1.442695, %v691_v41 }
 0x27f   :  { %1956 = vpow2.f32 %v693_v43 }
 0x280   :  { %v1953_v44 = vpop.eup %1952 }
 0x281   :  { %v484_v46 = vsel %vm471_vm1, %v1953_v44, 0.0 }
 0x282   :  { %485 = vadd.xlane.f32.xlu1 %v484_v46 }
 0x288   :  { %v1955_v48 = vpop.eup %1954 }
 0x289   :  { %v487_v49 = vsel %vm471_vm1, %v1955_v48, 0.0 }
 0x28a   :  { %488 = vadd.xlane.f32.xlu1 %v487_v49 }
 0x28c   :  { %v1957_v51 = vpop.eup %1956 }
 0x28d   :  { %v697_v52 = vsel %vm471_vm1, %v1957_v51, 0.0 }
 0x28e   :  { %698 = vadd.xlane.f32.xlu0 %v697_v52 }
 0x30b   :  { %v486_v53 = vpop.xlane.xlu1 %485 }
 0x30c   :  { %1958 = vrcp.f32 %v486_v53 }
 0x313   :  { %v489_v54 = vpop.xlane.xlu1 %488 }
 0x314   :  { %1960 = vrcp.f32 %v489_v54 }
 0x317   :  { %v699_v55 = vpop.xlane.xlu0 %698 }
 0x318   :  { %1962 = vrcp.f32 %v699_v55  ;;  %v814_v55 = vsel %vm2211_vm14, %v2198_v50, 0 }
 0x319   :  { %v1959_v56 = vpop.eup %1958 }
 0x31a   :  { %v492_v57 = vmul.f32 %v1959_v56, %v1953_v44 }
 0x31c   :  { %v494_v58 = vpack.c.bf16 %v492_v57, %v492_v57 }
 0x31e   :  { %1742 = vmatmul.mubr.msk.bf16.vlgmr.msra.gmra.mxu1 %vm471_vm1, %v494_v58 }
 0x31f   :  { %1746 = vmatpush3.bf16.msra.mxu1 %v2218_v5  ;;  %1747 = vmatprep.mubr.msk.bf16.mxu1 %vm2080_vm0, %v2079_v1 }
 0x320   :  { %1757 = vmatprep.subr.bf16.mxu1 %v2079_v1 }
 0x321   :  { %v1961_v59 = vpop.eup %1960 }
 0x322   :  { %v493_v60 = vmul.f32 %v1961_v59, %v1955_v48 }
 0x324   :  { %v495_v61 = vpack.c.bf16 %v493_v60, %v493_v60 }
 0x325   :  { %v1963_v62 = vpop.eup %1962 }
 0x326   :  { %1748 = vmatmul.mubr.msk.bf16.vlgmr.msra.gmra.mxu1 %vm471_vm1, %v495_v61  ;;  %v705_v63 = vmul.f32 %v1963_v62, %v1957_v51 }
 0x327   :  { %1758 = vmatpush3.bf16.xpose.msra.mxu1 %v2184_v47  ;;  %1759 = vmatprep.mubr.msk.bf16.mxu1 %vm2080_vm0, %v2079_v1 }
 0x328   :  { %v707_v0 = vpack.c.bf16 %v705_v63, %v705_v63  ;;  %1769 = vmatprep.subr.bf16.mxu1 %v2079_v1 }
 0x32a   :  { %1766 = vmatmul.mubr.msk.bf16.vlgmr.msra.gmra.mxu0 %vm471_vm1, %v707_v0 }
 0x32b   :  { %1776 = vmatpush3.bf16.xpose.msra.mxu0 %v2168_v40  ;;  %1777 = vmatprep.mubr.msk.bf16.mxu0 %vm2080_vm0, %v2079_v1 }
 0x32c   :  { %1787 = vmatprep.subr.bf16.mxu0 %v2079_v1 }
 0x32e   :  { %1760 = vmatmul.mubr.bf16.vlgmr.msra.gmra.mxu1 %v602_v3 }
 0x32f   :  { %1770 = vmatpush3.bf16.msra.mxu1 %v2227_v8  ;;  %1771 = vmatprep.mubr.msk.bf16.mxu1 %vm2080_vm0, %v2079_v1 }
 0x330   :  { %1781 = vmatprep.subr.bf16.mxu1 %v2079_v1 }
 0x332   :  { %1778 = vmatmul.mubr.bf16.vlgmr.msra.gmra.mxu0 %v813_v4 }
 0x333   :  { %1788 = vmatpush3.bf16.msra.mxu0 %v2238_v12  ;;  %1789 = vmatprep.mubr.msk.bf16.mxu0 %vm2080_vm0, %v2079_v1 }
 0x334   :  { %1799 = vmatprep.subr.bf16.mxu0 %v2079_v1 }
 0x3de   :  { %v537_v45 = vpop.f32.mrf.mxu1 }
 0x3e0   :  { %v1743_v5 = vpop.f32.mrf.mxu1 }
 0x3e2   :  { %v540_v6 = vpop.f32.mrf.mxu1 }
 0x3e4   :  { %v1744_v8 = vpop.f32.mrf.mxu1 }
 0x3e6   :  { %v2286_v9 = vpop.f32.mrf.mxu1 }
 0x3e8   :  { %v1749_v10 = vpop.f32.mrf.mxu1 }
 0x3ea   :  { %v586_v11 = vpop.f32.mrf.mxu1  ;;  %v749_v15 = vpop.f32.mrf.mxu0 }
 0x3eb   :  { %v2288_v17 = vadd.f32 %v749_v15, %v537_v45 }
 0x3ec   :  { %v1750_v18 = vpop.f32.mrf.mxu1  ;;  %v1767_v19 = vpop.f32.mrf.mxu0 }
 0x3ee   :  { %v679_v20 = vpop.f32.mrf.mxu1  ;;  %v752_v12 = vpop.f32.mrf.mxu0 }
 0x3ef   :  { %v688_v21 = vsel %vm471_vm1, %v679_v20, -inf }
 0x3f0   :  { %v1768_v22 = vpop.f32.mrf.mxu0  ;;  %689 = vmax.xlane.f32.xlu1 %v688_v21  ;;  %v1761_v24 = vpop.f32.mrf.mxu1 }
 0x3f2   :  { %v682_v25 = vpop.f32.mrf.mxu1  ;;  %v851_v26 = vpop.f32.mrf.mxu0 }
 0x3f3   :  { %v897_v27 = vsel %vm471_vm1, %v851_v26, -inf }
 0x3f4   :  { %898 = vmax.xlane.f32.xlu0 %v897_v27  ;;  %v1762_v28 = vpop.f32.mrf.mxu1  ;;  %v1779_v29 = vpop.f32.mrf.mxu0 }
 0x3f6   :  { %v854_v30 = vpop.f32.mrf.mxu0 }
 0x3f8   :  { %v1780_v31 = vpop.f32.mrf.mxu0 }
 0x479   :  { %v690_v32 = vpop.xlane.xlu1 %689 }
 0x47a   :  { %v692_v33 = vsub.f32 %v679_v20, %v690_v32  ;;  %v1026_v32 = vsel %vm2222_vm15, %v2198_v50, 0 }
 0x47c   :  { %v695_v34 = vmul.f32 1.442695, %v692_v33 }
 0x47d   :  { %v899_v35 = vpop.xlane.xlu0 %898 }
 0x47e   :  { %1964 = vpow2.f32 %v695_v34  ;;  %v903_v36 = vsub.f32 %v851_v26, %v899_v35 }
 0x480   :  { %v905_v37 = vmul.f32 1.442695, %v903_v36 }
 0x482   :  { %1966 = vpow2.f32 %v905_v37 }
 0x48b   :  { %v1965_v38 = vpop.eup %1964 }
 0x48c   :  { %v700_v39 = vsel %vm471_vm1, %v1965_v38, 0.0 }
 0x48d   :  { %701 = vadd.xlane.f32.xlu1 %v700_v39 }
 0x48f   :  { %v1967_v41 = vpop.eup %1966 }
 0x490   :  { %v909_v43 = vsel %vm471_vm1, %v1967_v41, 0.0 }
 0x491   :  { %910 = vadd.xlane.f32.xlu0 %v909_v43 }
 0x516   :  { %v702_v44 = vpop.xlane.xlu1 %701 }
 0x517   :  { %1968 = vrcp.f32 %v702_v44 }
 0x51a   :  { %v911_v46 = vpop.xlane.xlu0 %910 }
 0x51b   :  { %1970 = vrcp.f32 %v911_v46 }
 0x524   :  { %v1969_v48 = vpop.eup %1968 }
 0x525   :  { %v706_v49 = vmul.f32 %v1969_v48, %v1965_v38 }
 0x527   :  { %v708_v51 = vpack.c.bf16 %v706_v49, %v706_v49 }
 0x528   :  { %v1971_v52 = vpop.eup %1970 }
 0x529   :  { %1772 = vmatmul.mubr.msk.bf16.vlgmr.msra.gmra.mxu1 %vm471_vm1, %v708_v51  ;;  %v917_v53 = vmul.f32 %v1971_v52, %v1967_v41 }
 0x52a   :  { %1782 = vmatpush3.bf16.xpose.msra.mxu1 %v2184_v47  ;;  %1783 = vmatprep.mubr.msk.bf16.mxu1 %vm2080_vm0, %v2079_v1 }
 0x52b   :  { %v919_v54 = vpack.c.bf16 %v917_v53, %v917_v53  ;;  %1793 = vmatprep.subr.bf16.mxu1 %v2079_v1 }
 0x52d   :  { %1790 = vmatmul.mubr.msk.bf16.vlgmr.msra.gmra.mxu0 %vm471_vm1, %v919_v54  ;;  %v1927_v54 = vld [vmem:[#allocation5 + $0x38] sm:$0xff]  }
 0x52e   :  { %1800 = vmatpush3.bf16.xpose.msra.mxu0 %v2168_v40  ;;  %1801 = vmatprep.mubr.msk.bf16.mxu0 %vm2080_vm0, %v2079_v1  ;;  %v1025_v40 = vsel %vm2222_vm15, %v2174_v42, 0 }
 0x52f   :  { %1811 = vmatprep.subr.bf16.mxu0 %v2079_v1 }
 0x531   :  { %1784 = vmatmul.mubr.bf16.vlgmr.msra.gmra.mxu1 %v814_v55  ;;  %v1928_v55 = vld [vmem:[#allocation5 + $0x30] sm:$0xff]  }
 0x532   :  { %1794 = vmatpush3.bf16.msra.mxu1 %v2241_v13  ;;  %1795 = vmatprep.mubr.msk.bf16.mxu1 %vm2080_vm0, %v2079_v1 }
 0x533   :  { %1805 = vmatprep.subr.bf16.mxu1 %v2079_v1 }
 0x535   :  { %1802 = vmatmul.mubr.bf16.vlgmr.msra.gmra.mxu0 %v1025_v40  ;;  %v1929_v40 = vld [vmem:[#allocation5 + $0x28] sm:$0xff]  }
 0x536   :  { %1812 = vmatpush3.bf16.msra.mxu0 %v2244_v14  ;;  %1813 = vmatprep.mubr.msk.bf16.mxu0 %vm2080_vm0, %v2079_v1 }
 0x537   :  { %1823 = vmatprep.subr.bf16.mxu0 %v2079_v1 }
 0x5e9   :  { %v795_v2 = vpop.f32.mrf.mxu1 }
 0x5eb   :  { %v1773_v56 = vpop.f32.mrf.mxu1 }
 0x5ec   :  { %v1931_v56 = vld [vmem:[#allocation5 + $0x18] sm:$0xff]  }
 0x5ed   :  { %v798_v13 = vpop.f32.mrf.mxu1  ;;  %v961_v57 = vpop.f32.mrf.mxu0 }
 0x5ee   :  { %v1015_v58 = vadd.f32 %v961_v57, %v2288_v17  ;;  %v1932_v13 = vld [vmem:[#allocation5 + $0x10] sm:$0xff]   ;;  %v1933_v57 = vld [vmem:[#allocation5 + $0x8] sm:$0xff]  }
 0x5ef   :  { %v1774_v59 = vpop.f32.mrf.mxu1  ;;  %v1791_v60 = vpop.f32.mrf.mxu0 }
 0x5f1   :  { %v891_v61 = vpop.f32.mrf.mxu1  ;;  %v964_v62 = vpop.f32.mrf.mxu0 }
 0x5f2   :  { %v900_v42 = vsel %vm471_vm1, %v891_v61, -inf  ;;  %v1934_v62 = vld [vmem:[#allocation5] sm:$0xff]  }
 0x5f3   :  { %v1792_v63 = vpop.f32.mrf.mxu0  ;;  %901 = vmax.xlane.f32.xlu1 %v900_v42  ;;  %v1785_v14 = vpop.f32.mrf.mxu1  ;;  %v1935_v42 = vld [vmem:[#allocation7 + $0x38] sm:$0xff]  }
 0x5f4   :  { %v1936_v63 = vld [vmem:[#allocation7 + $0x30] sm:$0xff]   ;;  %v1937_v14 = vld [vmem:[#allocation7 + $0x28] sm:$0xff]  }
 0x5f5   :  { %v894_v0 = vpop.f32.mrf.mxu1  ;;  %v1063_v3 = vpop.f32.mrf.mxu0 }
 0x5f6   :  { %v1109_v4 = vsel %vm471_vm1, %v1063_v3, -inf  ;;  %v1938_v0 = vld [vmem:[#allocation7 + $0x20] sm:$0xff]  }
 0x5f7   :  { %1110 = vmax.xlane.f32.xlu0 %v1109_v4  ;;  %v1786_v45 = vpop.f32.mrf.mxu1  ;;  %v1803_v5 = vpop.f32.mrf.mxu0 }
 0x5f9   :  { %v1066_v6 = vpop.f32.mrf.mxu0 }
 0x5fb   :  { %v1804_v8 = vpop.f32.mrf.mxu0 }
 0x67c   :  { %v902_v10 = vpop.xlane.xlu1 %901 }
 0x67d   :  { %v904_v11 = vsub.f32 %v891_v61, %v902_v10 }
 0x67f   :  { %v907_v15 = vmul.f32 1.442695, %v904_v11  ;;  %v1940_v11 = vld [vmem:[#allocation7 + $0x10] sm:$0xff]  }
 0x680   :  { %v1111_v17 = vpop.xlane.xlu0 %1110 }
 0x681   :  { %1972 = vpow2.f32 %v907_v15  ;;  %v1115_v18 = vsub.f32 %v1063_v3, %v1111_v17  ;;  %v1939_v3 = vld [vmem:[#allocation7 + $0x18] sm:$0xff]   ;;  %v1941_v15 = vld [vmem:[#allocation7 + $0x8] sm:$0xff]   ;;  %v1942_v17 = vld [vmem:[#allocation7] sm:$0xff]  }
 0x683   :  { %v1117_v19 = vmul.f32 1.442695, %v1115_v18  ;;  %v1943_v18 = vld [vmem:[#allocation8 + $0x38] sm:$0xff]  }
 0x685   :  { %1974 = vpow2.f32 %v1117_v19  ;;  %v1944_v19 = vld [vmem:[#allocation8 + $0x30] sm:$0xff]  }
 0x68e   :  { %v1973_v20 = vpop.eup %1972 }
 0x68f   :  { %v912_v12 = vsel %vm471_vm1, %v1973_v20, 0.0 }
 0x690   :  { %913 = vadd.xlane.f32.xlu1 %v912_v12  ;;  %v1946_v12 = vld [vmem:[#allocation8 + $0x20] sm:$0xff]  }
 0x692   :  { %v1975_v21 = vpop.eup %1974 }
 0x693   :  { %v1121_v22 = vsel %vm471_vm1, %v1975_v21, 0.0 }
 0x694   :  { %1122 = vadd.xlane.f32.xlu0 %v1121_v22  ;;  %v1948_v22 = vld [vmem:[#allocation8 + $0x10] sm:$0xff]  }
 0x719   :  { %v914_v24 = vpop.xlane.xlu1 %913 }
 0x71a   :  { %1976 = vrcp.f32 %v914_v24  ;;  %v1608_v24 = vld [vmem:[%s2389_s4] ss:$0 sm:$0xff] }
 0x71d   :  { %v1123_v25 = vpop.xlane.xlu0 %1122 }
 0x71e   :  { %1978 = vrcp.f32 %v1123_v25 }
 0x727   :  { %v1977_v26 = vpop.eup %1976 }
 0x728   :  { %v918_v27 = vmul.f32 %v1977_v26, %v1973_v20  ;;  %v1945_v20 = vld [vmem:[#allocation8 + $0x28] sm:$0xff]  }
 0x72a   :  { %v920_v28 = vpack.c.bf16 %v918_v27, %v918_v27  ;;  %v84_v27 = vunpack.c.l.bf16 %v2149_v23 }
 0x72b   :  { %v1979_v29 = vpop.eup %1978 }
 0x72c   :  { %1796 = vmatmul.mubr.msk.bf16.vlgmr.msra.gmra.mxu1 %vm471_vm1, %v920_v28  ;;  %v1129_v30 = vmul.f32 %v1979_v29, %v1975_v21  ;;  %v1947_v21 = vld [vmem:[#allocation8 + $0x18] sm:$0xff]   ;;  %v85_v29 = vunpack.c.h.bf16 %v2149_v23 }
 0x72d   :  { %1806 = vmatpush3.bf16.xpose.msra.mxu1 %v2184_v47  ;;  %1807 = vmatprep.mubr.msk.bf16.mxu1 %vm2080_vm0, %v2079_v1  ;;  %v804_v47 = vadd.f32 %v795_v2, %v2286_v9  ;;  %v1930_v2 = vld [vmem:[#allocation5 + $0x20] sm:$0xff]  }
 0x72e   :  { %v1131_v31 = vpack.c.bf16 %v1129_v30, %v1129_v30  ;;  %1817 = vmatprep.subr.bf16.mxu1 %v2079_v1 }
 0x730   :  { %1814 = vmatmul.mubr.msk.bf16.vlgmr.msra.gmra.mxu0 %vm471_vm1, %v1131_v31 }
 0x731   :  { %1839 = vmatprep.mubr.msk.bf16.mxu0 %vm2080_vm0, %v2079_v1  ;;  %1824 = vmatpush3.bf16.msra.mxu0 %v1927_v54 }
 0x732   :  { %1825 = vmatprep.subr.bf16.mxu0 %v2079_v1 }
 0x734   :  { %1808 = vmatmul.mubr.bf16.vlgmr.msra.gmra.mxu1 %v1026_v32 }
 0x735   :  { %1818 = vmatpush3.bf16.msra.mxu1 %v2249_v16  ;;  %1819 = vmatprep.mubr.msk.bf16.mxu1 %vm2080_vm0, %v2079_v1 }
 0x736   :  { %1843 = vmatprep.subr.bf16.mxu1 %v2079_v1  ;;  %1826 = vmatpush3.bf16.msra.mxu0 %v1928_v55 }
 0x737   :  { %1827 = vmatprep.subr.bf16.mxu0 %v2079_v1 }
 0x73a   :  { %1828 = vmatpush3.bf16.msra.mxu0 %v1929_v40 }
 0x73b   :  { %1829 = vmatprep.subr.bf16.mxu0 %v2079_v1 }
 0x73e   :  { %1830 = vmatpush3.bf16.msra.mxu0 %v1930_v2 }
 0x73f   :  { %1831 = vmatprep.subr.bf16.mxu0 %v2079_v1 }
 0x742   :  { %1832 = vmatpush3.bf16.msra.mxu0 %v1931_v56 }
 0x743   :  { %1833 = vmatprep.subr.bf16.mxu0 %v2079_v1 }
 0x746   :  { %1834 = vmatpush3.bf16.msra.mxu0 %v1932_v13 }
 0x747   :  { %1835 = vmatprep.subr.bf16.mxu0 %v2079_v1 }
 0x74a   :  { %1836 = vmatpush3.bf16.msra.mxu0 %v1933_v57 }
 0x74b   :  { %1837 = vmatprep.subr.bf16.mxu0 %v2079_v1 }
 0x74e   :  { %1838 = vmatpush3.bf16.msra.mxu0 %v1934_v62 }
 0x74f   :  { %1863 = vmatprep.subr.bf16.mxu0 %v2079_v1 }
 0x7ec   :  { %v1007_v33 = vpop.f32.mrf.mxu1 }
 0x7ed   :  { %v2339_v34 = vadd.f32 %v1007_v33, %v804_v47 }
 0x7ee   :  { %v1797_v35 = vpop.f32.mrf.mxu1 }
 0x7ef   :  { %v1949_v35 = vld [vmem:[#allocation8 + $0x8] sm:$0xff]  }
 0x7f0   :  { %v1010_v36 = vpop.f32.mrf.mxu1  ;;  %v1173_v37 = vpop.f32.mrf.mxu0 }
 0x7f1   :  { %v2341_v38 = vadd.f32 %v1173_v37, %v1015_v58  ;;  %v1950_v36 = vld [vmem:[#allocation8] sm:$0xff]  }
 0x7f2   :  { %v1798_v7 = vpop.f32.mrf.mxu1  ;;  %v1815_v50 = vpop.f32.mrf.mxu0 }
 0x7f4   :  { %v1103_v39 = vpop.f32.mrf.mxu1  ;;  %v1176_v41 = vpop.f32.mrf.mxu0 }
 0x7f5   :  { %v1112_v16 = vsel %vm471_vm1, %v1103_v39, -inf }
 0x7f6   :  { %v1816_v43 = vpop.f32.mrf.mxu0  ;;  %1113 = vmax.xlane.f32.xlu1 %v1112_v16  ;;  %v1809_v44 = vpop.f32.mrf.mxu1 }
 0x7f8   :  { %v1106_v46 = vpop.f32.mrf.mxu1 }
 0x7fa   :  { %v1810_v48 = vpop.f32.mrf.mxu1 }
 0x87f   :  { %v1114_v9 = vpop.xlane.xlu1 %1113 }
 0x880   :  { %v1116_v49 = vsub.f32 %v1103_v39, %v1114_v9 }
 0x882   :  { %v1119_v51 = vmul.f32 1.442695, %v1116_v49 }
 0x884   :  { %1980 = vpow2.f32 %v1119_v51 }
 0x891   :  { %v1981_v52 = vpop.eup %1980 }
 0x892   :  { %v1124_v53 = vsel %vm471_vm1, %v1981_v52, 0.0 }
 0x893   :  { %1125 = vadd.xlane.f32.xlu1 %v1124_v53 }
 0x91c   :  { %v1126_v58 = vpop.xlane.xlu1 %1125 }
 0x91d   :  { %1982 = vrcp.f32 %v1126_v58 }
 0x92a   :  { %v1983_v59 = vpop.eup %1982 }
 0x92b   :  { %v1130_v60 = vmul.f32 %v1983_v59, %v1981_v52 }
 0x92d   :  { %v1132_v61 = vpack.c.bf16 %v1130_v60, %v1130_v60 }
 0x92f   :  { %1820 = vmatmul.mubr.msk.bf16.vlgmr.msra.gmra.mxu1 %vm471_vm1, %v1132_v61 }
 0x930   :  { %1859 = vmatprep.mubr.msk.bf16.mxu1 %vm2080_vm0, %v2079_v1  ;;  %1844 = vmatpush3.bf16.msra.mxu1 %v1935_v42 }
 0x931   :  { %1845 = vmatprep.subr.bf16.mxu1 %v2079_v1 }
 0x934   :  { %1846 = vmatpush3.bf16.msra.mxu1 %v1936_v63 }
 0x935   :  { %1847 = vmatprep.subr.bf16.mxu1 %v2079_v1 }
 0x938   :  { %1848 = vmatpush3.bf16.msra.mxu1 %v1937_v14 }
 0x939   :  { %1849 = vmatprep.subr.bf16.mxu1 %v2079_v1 }
 0x93c   :  { %1850 = vmatpush3.bf16.msra.mxu1 %v1938_v0 }
 0x93d   :  { %1851 = vmatprep.subr.bf16.mxu1 %v2079_v1 }
 0x940   :  { %1852 = vmatpush3.bf16.msra.mxu1 %v1939_v3 }
 0x941   :  { %1853 = vmatprep.subr.bf16.mxu1 %v2079_v1 }
 0x944   :  { %1854 = vmatpush3.bf16.msra.mxu1 %v1940_v11 }
 0x945   :  { %1855 = vmatprep.subr.bf16.mxu1 %v2079_v1 }
 0x948   :  { %1856 = vmatpush3.bf16.msra.mxu1 %v1941_v15 }
 0x949   :  { %1857 = vmatprep.subr.bf16.mxu1 %v2079_v1 }
 0x94c   :  { %1858 = vmatpush3.bf16.msra.mxu1 %v1942_v17 }
 0x9ef   :  { %v1219_v4 = vpop.f32.mrf.mxu1 }
 0x9f0   :  { %v1228_v45 = vadd.f32 %v1219_v4, %v2339_v34 }
 0x9f1   :  { %v1821_v5 = vpop.f32.mrf.mxu1 }
 0x9f2   :  { %v1233_v6 = vpack.c.bf16 %v1228_v45, %v2341_v38 }
 0x9f3   :  { %v1222_v8 = vpop.f32.mrf.mxu1 }
 0x9f4   :  { %1840 = vmatmul.mubr.bf16.vlgmr.msra.gmra.mxu0 %v1233_v6 }
 0x9f5   :  { %v1822_v10 = vpop.f32.mrf.mxu1  ;;  %1879 = vmatprep.mubr.msk.bf16.mxu0 %vm2080_vm0, %v2079_v1  ;;  %1864 = vmatpush3.bf16.msra.mxu0 %v1943_v18 }
 0x9f6   :  { %1865 = vmatprep.subr.bf16.mxu0 %v2079_v1 }
 0x9f9   :  { %1866 = vmatpush3.bf16.msra.mxu0 %v1944_v19 }
 0x9fa   :  { %1867 = vmatprep.subr.bf16.mxu0 %v2079_v1 }
 0x9fd   :  { %1868 = vmatpush3.bf16.msra.mxu0 %v1945_v20 }
 0x9fe   :  { %1869 = vmatprep.subr.bf16.mxu0 %v2079_v1 }
 0xa01   :  { %1870 = vmatpush3.bf16.msra.mxu0 %v1946_v12 }
 0xa02   :  { %1871 = vmatprep.subr.bf16.mxu0 %v2079_v1 }
 0xa05   :  { %1872 = vmatpush3.bf16.msra.mxu0 %v1947_v21 }
 0xa06   :  { %1873 = vmatprep.subr.bf16.mxu0 %v2079_v1 }
 0xa09   :  { %1874 = vmatpush3.bf16.msra.mxu0 %v1948_v22 }
 0xa0a   :  { %1875 = vmatprep.subr.bf16.mxu0 %v2079_v1 }
 0xa0d   :  { %1876 = vmatpush3.bf16.msra.mxu0 %v1949_v35 }
 0xa0e   :  { %1877 = vmatprep.subr.bf16.mxu0 %v2079_v1 }
 0xa11   :  { %1878 = vmatpush3.bf16.msra.mxu0 %v1950_v36 }
 0xab4   :  { %v1339_v25 = vpop.f32.mrf.mxu0 }
 0xab5   :  { %v1340_v28 = vadd.f32 %v1608_v24, %v1339_v25 }
 0xab6   :  { %v1841_v26 = vpop.f32.mrf.mxu0 }
 0xab7   :  { %v1346_v47 = vadd.f32 %v1340_v28, %v84_v27 }
 0xab8   :  { %v1342_v30 = vpop.f32.mrf.mxu0 }
 0xab9   :  { %v1343_v31 = vadd.f32 %v1608_v24, %v1342_v30 }
 0xaba   :  { %v1842_v32 = vpop.f32.mrf.mxu0 }
 0xabb   :  { %v1347_v33 = vadd.f32 %v1343_v31, %v85_v29 }
 0xabd   :  { %v1348_v34 = vpack.c.bf16 %v1347_v33, %v1346_v47 }
 0xabf   :  { %1860 = vmatmul.mubr.bf16.vlgmr.msra.gmra.mxu1 %v1348_v34 }
 0xb7f   :  { %v1447_v37 = vpop.f32.mrf.mxu1 }
 0xb81   :  { %v1861_v38 = vpop.f32.mrf.mxu1 }
 0xb83   :  { %v1450_v7 = vpop.f32.mrf.mxu1 }
 0xb84   :  { %v1454_v50 = vpack.c.bf16 %v1450_v7, %v1447_v37 }
 0xb85   :  { %v1862_v39 = vpop.f32.mrf.mxu1 }
 0xb86   :  { %1880 = vmatmul.mubr.bf16.vlgmr.msra.gmra.mxu0 %v1454_v50 }
 0xc46   :  { %v1553_v23 = vpop.f32.mrf.mxu0 }
 0xc47   :  { %v1554_v41 = vadd.f32 %v1553_v23, %v1346_v47 }
 0xc48   :  { %v1881_v16 = vpop.f32.mrf.mxu0 }
 0xc49   :  { %1560 = vst [vmem:[%s2392_s7] sm:$0xff] %v1554_v41 }
 0xc4a   :  { %v1556_v43 = vpop.f32.mrf.mxu0 }
 0xc4b   :  { %v1557_v44 = vadd.f32 %v1556_v43, %v1347_v33 }
 0xc4c   :  { %v1882_v46 = vpop.f32.mrf.mxu0 }
 0xc4d   :  { %1561 = vst [vmem:[%s2392_s7 + $0x8] sm:$0xff] %v1557_v44 }
 0xc4e   :  { %1566 = vsyncpa [#allocation4], 1 }
 0xc4f   :  { %1567 = vsyncpa [#allocation6], 1 }
 0xc50   :  { %1568 = vsyncpa [#allocation9], 1 }

</bundles_post_ra>
